<compile_context>
chip_gen: v6e
topology: v6e:2x2x1
jax: 0.10.0
libtpu: 0.0.40
codegen_flags: <defaults>
</compile_context>

<pallas_src>
import jax
import jax.numpy as jnp
from jax.experimental import pallas as pl
from jax.experimental.pallas import tpu as pltpu


# ---------------------------------------------------------------------------
# Static configuration
# ---------------------------------------------------------------------------
_SMALL_NF = 16         # VPU path when nf <= _SMALL_NF and nout <= _SMALL_NOUT
_SMALL_NOUT = 8
_SMALL_TILE_B = 4096   # lane-dim batch tile for the VPU path (multiple of 128)
_MXU_TILE_B = 512      # sublane-dim batch tile for the MXU path (multiple of 8)


def _round_up(x, m):
    return ((x + m - 1) // m) * m


# ---------------------------------------------------------------------------
# Small-head (VPU, lane-dense) path
# ---------------------------------------------------------------------------
def _vpu_kernel(w_ref, mu_ref, yT_ref, out_ref):
    # w_ref  : (nout, nf)    SMEM (read as scalars)
    # mu_ref : (1, nout)     SMEM (read as scalars)
    # yT_ref : (nf, TILE_B)  VMEM, batch in the lane dimension
    # out_ref: (nout, TILE_B)VMEM, batch in the lane dimension
    nout, nf = w_ref.shape
    y = yT_ref[...]                                   # (nf, TILE_B) f32
    rows = []
    for o in range(nout):                             # static unroll (nout small)
        acc = w_ref[o, 0] * y[0:1, :]
        for k in range(1, nf):                        # static unroll (nf small)
            acc = acc + w_ref[o, k] * y[k:k + 1, :]
        rows.append(acc + mu_ref[0, o])               # fold bias on the VPU
    out = rows[0] if nout == 1 else jnp.concatenate(rows, axis=0)
    out_ref[...] = out.astype(out_ref.dtype)


def _forward_small(y2d, W, mu):
    B, nf = y2d.shape
    nout = W.shape[0]

    # Lane-dense orientation: batch -> lanes (layout plumbing in the wrapper).
    yT = y2d.T                                        # (nf, B)

    if B <= _SMALL_TILE_B:
        tile_b, b_pad = B, B                          # full-dim block: no (8,128) constraint
    else:
        tile_b = _SMALL_TILE_B                        # multiple of 128
        b_pad = _round_up(B, tile_b)
        yT = jnp.pad(yT, ((0, 0), (0, b_pad - B)))
    grid_b = b_pad // tile_b

    out_t = pl.pallas_call(
        _vpu_kernel,
        out_shape=jax.ShapeDtypeStruct((nout, b_pad), jnp.float32),
        grid=(grid_b,),
        in_specs=[
            pl.BlockSpec(memory_space=pltpu.MemorySpace.SMEM),      # W  (scalars)
            pl.BlockSpec(memory_space=pltpu.MemorySpace.SMEM),      # mu (scalars)
            pl.BlockSpec((nf, tile_b), lambda i: (0, i)),           # yT tile
        ],
        out_specs=pl.BlockSpec((nout, tile_b), lambda i: (0, i)),
        compiler_params=pltpu.CompilerParams(
            dimension_semantics=("parallel",)),
    )(W, mu, yT)

    return out_t[:, :B].T                             # (B, nout)


# ---------------------------------------------------------------------------
# Wide-head (MXU) path
# ---------------------------------------------------------------------------
def _mxu_kernel(w_ref, mu_ref, y_ref, out_ref):
    # y_ref: (TILE_B, nf), w_ref: (nout, nf), mu_ref: (1, nout)
    # Contract directly on W's last dim — no w.T materialisation / XLU relayout.
    acc = jax.lax.dot_general(
        y_ref[...], w_ref[...],
        dimension_numbers=(((1,), (1,)), ((), ())),
        preferred_element_type=jnp.float32,
    )
    out_ref[...] = (acc + mu_ref[...]).astype(out_ref.dtype)


def _forward_mxu(y2d, W, mu):
    B, nf = y2d.shape
    nout = W.shape[0]

    tile_b = _MXU_TILE_B if B > _MXU_TILE_B else _round_up(B, 8)
    b_pad = _round_up(B, tile_b)
    if b_pad != B:
        y2d = jnp.pad(y2d, ((0, b_pad - B), (0, 0)))
    grid_b = b_pad // tile_b

    # Note: for very large nf on v6e/v7x, casting the y/W tiles to bfloat16
    # (f32 accumulation) would hit MXU peak; kept f32 to match the PyTorch
    # module's numerics.
    out = pl.pallas_call(
        _mxu_kernel,
        out_shape=jax.ShapeDtypeStruct((b_pad, nout), jnp.float32),
        grid=(grid_b,),
        in_specs=[
            pl.BlockSpec((nout, nf), lambda i: (0, 0)),     # W  (resident)
            pl.BlockSpec((1, nout), lambda i: (0, 0)),      # mu (resident)
            pl.BlockSpec((tile_b, nf), lambda i: (i, 0)),   # y tile
        ],
        out_specs=pl.BlockSpec((tile_b, nout), lambda i: (i, 0)),
        compiler_params=pltpu.CompilerParams(
            dimension_semantics=("parallel",)),
    )(W, mu, y2d)

    return out[:B, :]


# ---------------------------------------------------------------------------
# Public forward (Pallas equivalent of Classification.forward)
# ---------------------------------------------------------------------------
def classification_forward(Y0, W, mu):
    """Y0: (B, nf, 1), W: (nout, nf), mu: (1, nout)  ->  (B, nout) float32."""
    B, nf, t = Y0.shape
    assert t == 1, "trailing dim must be 1 so that .squeeze(1) applies"
    nout, nf_w = W.shape
    assert nf_w == nf and mu.shape == (1, nout)

    # Glue: Y0.transpose(1,2) followed by squeeze(1) == drop the trailing axis.
    y2d = Y0[:, :, 0].astype(jnp.float32)             # (B, nf)
    W = W.astype(jnp.float32)
    mu = mu.astype(jnp.float32)

    if nf <= _SMALL_NF and nout <= _SMALL_NOUT:
        return _forward_small(y2d, W, mu)
    return _forward_mxu(y2d, W, mu)


# ---------------------------------------------------------------------------
# Self-test
# ---------------------------------------------------------------------------
if __name__ == "__main__":
    base_key = jax.random.PRNGKey(0)

    def _reference(Y0, W, mu):
        Y = jnp.transpose(Y0, (0, 2, 1))              # (B, 1, nf)
        out = jnp.einsum("bif,of->bio", Y, W,
                         precision=jax.lax.Precision.HIGHEST) + mu
        return jnp.squeeze(out, axis=1)

    def _make(nf, nout, B, tag):
        k_y, k_w, k_mu = jax.random.split(jax.random.fold_in(base_key, tag), 3)
        W = jax.random.normal(k_w, (nout, nf), dtype=jnp.float32) * 0.1
        mu = jax.random.normal(k_mu, (1, nout), dtype=jnp.float32) * 0.1
        Y0 = jax.random.normal(k_y, (B, nf, 1), dtype=jnp.float32)
        return Y0, W, mu

    # --- Check 1: module-default shapes (nf=2, nout=1), single-block VPU path.
    Y0, W, mu = _make(nf=2, nout=1, B=8, tag=1)
    out = jax.block_until_ready(classification_forward(Y0, W, mu))
    ref = _reference(Y0, W, mu)
    assert out.shape == (8, 1), out.shape
    assert jnp.allclose(out, ref, atol=1e-5, rtol=1e-5)

    # --- Check 2: bigger batch -> tiled lane-dense grid (padding + 3 steps).
    Y0, W, mu = _make(nf=2, nout=1, B=9000, tag=2)
    out = jax.block_until_ready(classification_forward(Y0, W, mu))
    ref = _reference(Y0, W, mu)
    assert out.shape == (9000, 1), out.shape
    assert jnp.allclose(out, ref, atol=1e-5, rtol=1e-5)

    # --- Check 3: wider head -> MXU dot_general path. Looser tolerance because
    #     the MXU's default f32 matmul precision (bf16 passes) may differ from
    #     the HIGHEST-precision XLA reference.
    Y0, W, mu = _make(nf=64, nout=32, B=70, tag=3)
    out = jax.block_until_ready(classification_forward(Y0, W, mu))
    ref = _reference(Y0, W, mu)
    assert out.shape == (70, 32), out.shape
    assert jnp.allclose(out, ref, atol=5e-2, rtol=5e-2)

    print("KERNEL_OK")
</pallas_src>

<mosaic_0001>
module attributes {stable_mosaic.version = 11 : i64} {
  func.func @_vpu_kernel(%arg0: i32, %arg1: memref<1x2xf32, #tpu.memory_space<smem>>, %arg2: memref<1x1xf32, #tpu.memory_space<smem>>, %arg3: memref<2x8xf32, #tpu.memory_space<vmem>>, %arg4: memref<1x8xf32, #tpu.memory_space<vmem>>) attributes {dimension_semantics = [#tpu.dimension_semantics<parallel>], iteration_bounds = array<i64: 1>, scalar_prefetch = 0 : i64, scratch_operands = 0 : i64, tpu.core_type = #tpu.core_type<tc>, window_params = [{transform_indices = @transform_0, window_bounds = array<i64: 1, 2>}, {transform_indices = @transform_1, window_bounds = array<i64: 1, 1>}, {transform_indices = @transform_2, window_bounds = array<i64: 2, 8>}, {transform_indices = @transform_3, window_bounds = array<i64: 1, 8>}]} {
    %c0 = arith.constant 0 : index
    %c0_0 = arith.constant 0 : index
    %0 = vector.load %arg3[%c0, %c0_0] : memref<2x8xf32, #tpu.memory_space<vmem>>, vector<2x8xf32>
    %c0_1 = arith.constant 0 : index
    %c0_2 = arith.constant 0 : index
    %1 = memref.load %arg1[%c0_1, %c0_2] : memref<1x2xf32, #tpu.memory_space<smem>>
    %2 = vector.extract_strided_slice %0 {offsets = [0, 0], sizes = [1, 8], strides = [1, 1]} : vector<2x8xf32> to vector<1x8xf32>
    %3 = vector.broadcast %1 : f32 to vector<1x8xf32>
    %4 = arith.mulf %3, %2 : vector<1x8xf32>
    %c0_3 = arith.constant 0 : index
    %c1 = arith.constant 1 : index
    %5 = memref.load %arg1[%c0_3, %c1] : memref<1x2xf32, #tpu.memory_space<smem>>
    %6 = vector.extract_strided_slice %0 {offsets = [1, 0], sizes = [1, 8], strides = [1, 1]} : vector<2x8xf32> to vector<1x8xf32>
    %7 = vector.broadcast %5 : f32 to vector<1x8xf32>
    %8 = arith.mulf %7, %6 : vector<1x8xf32>
    %9 = arith.addf %4, %8 : vector<1x8xf32>
    %c0_4 = arith.constant 0 : index
    %c0_5 = arith.constant 0 : index
    %10 = memref.load %arg2[%c0_4, %c0_5] : memref<1x1xf32, #tpu.memory_space<smem>>
    %11 = vector.broadcast %10 : f32 to vector<1x8xf32>
    %12 = arith.addf %9, %11 : vector<1x8xf32>
    %c0_6 = arith.constant 0 : index
    %c0_7 = arith.constant 0 : index
    %13 = vector.load %arg4[%c0_6, %c0_7] : memref<1x8xf32, #tpu.memory_space<vmem>>, vector<1x8xf32>
    tpu.vector_store %arg4[%c0_6, %c0_7], %12 {strides = array<i32>} : memref<1x8xf32, #tpu.memory_space<vmem>>, vector<1x8xf32>,
    return
  }
  func.func @transform_0(%arg0: i32) -> (i32, i32) {
    %c0_i32 = arith.constant 0 : i32
    %c0_i32_0 = arith.constant 0 : i32
    %c0_i32_1 = arith.constant 0 : i32
    return %c0_i32, %c0_i32_0 : i32, i32
  }
  func.func @transform_1(%arg0: i32) -> (i32, i32) {
    %c0_i32 = arith.constant 0 : i32
    %c0_i32_0 = arith.constant 0 : i32
    %c0_i32_1 = arith.constant 0 : i32
    return %c0_i32, %c0_i32_0 : i32, i32
  }
  func.func @transform_2(%arg0: i32) -> (i32, i32) {
    %c0_i32 = arith.constant 0 : i32
    %c0_i32_0 = arith.constant 0 : i32
    return %c0_i32, %arg0 : i32, i32
  }
  func.func @transform_3(%arg0: i32) -> (i32, i32) {
    %c0_i32 = arith.constant 0 : i32
    %c0_i32_0 = arith.constant 0 : i32
    return %c0_i32, %arg0 : i32, i32
  }
}

</mosaic_0001>

<bundles_post_ra>
// kernel: tpu_custom_call.1
= control target key start
LH: loop header
LB: loop body
LE: loop exit
PB: predicated region body
PF: predicated region fallthrough
CT: control target
= control target key end

     0   :  { %9 = vsyncpa [#allocation5], 0  ;;  %s133_s0 = inlined_call_operand.vmem [shape: f32[1,2], index: 0, kind: input, shape index: {}]   ;;  %s134_s1 = inlined_call_operand.<no memory space> [shape: f32[1,1], index: 1, kind: input, shape index: {}]   ;;  %s135_s2 = inlined_call_operand.vmem [shape: f32[2,8], index: 2, kind: input, shape index: {}]   ;;  %s136_s3 = inlined_call_operand.hbm [shape: f32[1,8], index: 3, kind: output, shape index: {}]  }
   0x1   :  { %10 = vsyncpa [#allocation4], 0  ;;  %s17_s14 = sshll.u32 %s133_s0, 4  ;;  %s18_s14 = int_to_ptr.vmem [resolvable:$true] %s17_s14 }
   0x2   :  { %s63_s15 = scalar_lea.vmem %s18_s14, 16  ;;  %p68_p1 = scmp.lt.s32.totalorder %s18_s14, %s18_s14 }
   0x3   :  { %p64_p0 = scmp.ne.s32.totalorder %s18_s14, %s63_s15  ;;  %p69_p2 = scmp.lt.s32.totalorder %s63_s15, %s63_s15 }
   0x5   :  { %p70_p3 = por %p69_p2, %p68_p1 }
   0x7   :  { %p71_p4 = pnand %p70_p3, %p64_p0 }
   0x9   :  { %74 = shalt.err (!%p71_p4)
}
   0xa   :  { %s99_s16 = smov [#allocation3]  }
   0xb   :  { %20 = dma.vmem_to_smem %s18_s14, 16, %s99_s16, [#allocation5]  }
   0xc   :  { %95 = dma.done.wait [#allocation5], 16  }
   0xd   :  { %96 = vsyncadd [#allocation5], 4294967280 }
   0xe   :  { %28 = sfence }
   0xf   :  { %s30_s17 = sld [smem:[#allocation3]]  ;;  %v29_v0 = vld [vmem:[%s135_s2] sm:$0x3]  ;;  %v41_v6 = vstv %s134_s1  ;;  %s100_s22 = smov [#allocation6]   ;;  %vm43_vm0 = vcmask 57344  }
  0x10   :  { %s60_s18 = sld [smem:[#allocation3 + $0x1]]  ;;  %s51_s23 = sshll.u32 %s100_s22, 4  ;;  %s52_s23 = int_to_ptr.vmem [resolvable:$true] %s51_s23 }
  0x11   :  { %s75_s24 = scalar_lea.vmem %s52_s23, 16  ;;  %s79_s25 = scalar_lea.vmem %s52_s23, 32 }
  0x12   :  { %p76_p5 = scmp.ne.s32.totalorder %s52_s23, %s75_s24  ;;  %p80_p6 = scmp.lt.s32.totalorder %s52_s23, %s52_s23 }
  0x13   :  { %p81_p7 = scmp.lt.s32.totalorder %s79_s25, %s75_s24 }
  0x15   :  { %v31_v1 = vstv %s30_s17  ;;  %p82_p8 = por %p81_p7, %p80_p6 }
  0x16   :  { %v34_v2 = vstv %s60_s18  ;;  %v32_v3 = vmul.f32 %v31_v1, %v29_v0 }
  0x17   :  { %v35_v4 = vmul.f32 %v34_v2, %v29_v0  ;;  %p83_p9 = pnand %p82_p8, %p76_p5 }
  0x19   :  { %v37_v5 = vrot.slane %v35_v4, 1 }
  0x1b   :  { %v39_v7 = vadd.f32 %v37_v5, %v32_v3 }
  0x1d   :  { %v42_v8 = vadd.f32 %v41_v6, %v39_v7 }
  0x1f   :  { %44 = vst.msk [vmem:[#allocation6] sm:$0x1] %vm43_vm0, %v42_v8 }
  0x20   :  { %86 = shalt.err (!%p83_p9)
}
  0x21   :  { %54 = dma.vmem_to_hbm [thread:$0]  %s52_s23, 16, %s136_s3, [#allocation4]  }
  0x22   :  { %97 = dma.done.wait [#allocation4], 16  }
  0x23   :  { %98 = vsyncadd [#allocation4], 4294967280 }
  0x24   :  { %58 = vsyncpa [#allocation4], 1 }
  0x25   :  { %59 = vsyncpa [#allocation5], 1 }

</bundles_post_ra>
